<compile_context>
chip_gen: v7x
topology: tpu7x:2x2x1
jax: 0.10.0
libtpu: 0.0.40
codegen_flags: <defaults>
</compile_context>

<pallas_src>
import functools

import jax
import jax.numpy as jnp
import numpy as np
from jax.experimental import pallas as pl
from jax.experimental.pallas import tpu as pltpu


def _ffl_smoothl1_kernel(pred_ref, targ_ref, cw_ref, sw_ref, ch_ref, sh_ref,
                         out_ref, *, tb, h, w):
    # diff block (tb, h, w) in f32 (inputs may be bf16/f16/f32)
    d = pred_ref[...].astype(jnp.float32) - targ_ref[...].astype(jnp.float32)

    # SmoothL1 (beta = 1.0) partial sum over the block
    ad = jnp.abs(d)
    sl1 = jnp.sum(jnp.where(ad < 1.0, 0.5 * ad * ad, ad - 0.5))

    # ---- 2-D DFT of every image via plain 2-D MXU matmuls ------------------
    # stage 1: contract W for all tb*h rows at once
    dbf = d.reshape(tb * h, w).astype(jnp.bfloat16)
    xc = jnp.dot(dbf, cw_ref[...], preferred_element_type=jnp.float32)   # (tb*h, w)
    xs = jnp.dot(dbf, sw_ref[...], preferred_element_type=jnp.float32)

    # per-image minor transpose so the H contraction is a plain 2-D matmul
    xct = jnp.transpose(xc.reshape(tb, h, w), (0, 2, 1)).reshape(tb * w, h)
    xst = jnp.transpose(xs.reshape(tb, h, w), (0, 2, 1)).reshape(tb * w, h)
    xct = xct.astype(jnp.bfloat16)
    xst = xst.astype(jnp.bfloat16)

    # stage 2: contract H (cos/sin separate -> quadrants never sliced in-vreg)
    zcc = jnp.dot(xct, ch_ref[...], preferred_element_type=jnp.float32)  # (tb*w, h)
    zss = jnp.dot(xst, sh_ref[...], preferred_element_type=jnp.float32)
    zcs = jnp.dot(xst, ch_ref[...], preferred_element_type=jnp.float32)
    zsc = jnp.dot(xct, sh_ref[...], preferred_element_type=jnp.float32)

    re = zcc - zss
    im = zcs + zsc                                    # sign irrelevant (squared)
    # 'ortho'-normalised |F|^2, scaled in-kernel so fd**1.5 cannot overflow f32
    fd = ((re * re + im * im) * (1.0 / (h * w))).reshape(tb, w, h)

    # focal weight w = sqrt(fd)/max(sqrt(fd)) per image (alpha=1, clip no-op):
    #   sum(w * fd) == sum(fd^1.5) * rsqrt(max fd); guard all-zero images (0/0).
    m = jnp.max(jnp.max(fd, axis=2, keepdims=True), axis=1, keepdims=True)   # (tb,1,1)
    s = jnp.sum(jnp.sum(fd * jnp.sqrt(fd), axis=2, keepdims=True),
                axis=1, keepdims=True)                                       # (tb,1,1)
    inv = jnp.where(m > 0.0, jax.lax.rsqrt(m), 0.0)
    ffl = jnp.sum(s * inv)

    # ffl and sl1 share the same final 1/(B*H*W) mean -> single merged partial
    out_ref[...] = jnp.full((1, 1, 1), ffl + sl1, dtype=jnp.float32)


def focal_freq_l1_loss(pred, target):
    """pred, target: (N, C, H, W). Returns scalar FocalFrequency + SmoothL1 loss."""
    N, C, H, W = pred.shape
    B = N * C
    p = pred.reshape(B, H, W)       # native dtype, no extra HBM copy
    t = target.reshape(B, H, W)

    # Images per grid step: ~1024 rows amortises per-step pipeline overhead;
    # cap the block so f32 temporaries stay inside v7x's 64 MiB VMEM, and keep
    # g >= 2 so both v7x TensorCores get work. tb must divide B (no padding).
    rows_target = 1024
    max_block_elems = 256 * 1024                 # ~1 MiB f32 per input block
    tb_cap = max(1, rows_target // H)
    while tb_cap > 1 and tb_cap * H * W > max_block_elems:
        tb_cap //= 2
    if B >= 2:
        tb_cap = min(tb_cap, B // 2)
    tb_cap = max(1, min(tb_cap, B))
    tb = 1
    for cand in range(tb_cap, 0, -1):            # largest divisor of B <= cap
        if B % cand == 0:
            tb = cand
            break
    g = B // tb

    # symmetric DFT cos/sin tables (built once in f64, stored bf16)
    kh = np.arange(H, dtype=np.float64)
    ah = 2.0 * np.pi * np.outer(kh, kh) / H
    kw = np.arange(W, dtype=np.float64)
    aw = 2.0 * np.pi * np.outer(kw, kw) / W
    ch = jnp.asarray(np.cos(ah), dtype=jnp.bfloat16)   # (H, H)
    sh = jnp.asarray(np.sin(ah), dtype=jnp.bfloat16)
    cw = jnp.asarray(np.cos(aw), dtype=jnp.bfloat16)   # (W, W)
    sw = jnp.asarray(np.sin(aw), dtype=jnp.bfloat16)

    kernel = functools.partial(_ffl_smoothl1_kernel, tb=tb, h=H, w=W)

    parts = pl.pallas_call(
        kernel,
        out_shape=jax.ShapeDtypeStruct((g, 1, 1), jnp.float32),
        grid_spec=pltpu.PrefetchScalarGridSpec(
            num_scalar_prefetch=0,
            grid=(g,),
            in_specs=[
                pl.BlockSpec((tb, H, W), lambda i: (i, 0, 0)),   # pred block
                pl.BlockSpec((tb, H, W), lambda i: (i, 0, 0)),   # target block
                pl.BlockSpec((W, W), lambda i: (0, 0)),          # CW
                pl.BlockSpec((W, W), lambda i: (0, 0)),          # SW
                pl.BlockSpec((H, H), lambda i: (0, 0)),          # CH
                pl.BlockSpec((H, H), lambda i: (0, 0)),          # SH
            ],
            out_specs=pl.BlockSpec((1, 1, 1), lambda i: (i, 0, 0)),
        ),
        compiler_params=pltpu.CompilerParams(
            dimension_semantics=("parallel",),     # no cross-step carry
            vmem_limit_bytes=32 * 1024 * 1024),
    )(p, t, cw, sw, ch, sh)

    # both terms are means over the original N*C*H*W elements
    return jnp.sum(parts) / float(B * H * W)


def _reference(pred, target):
    """Pure-JAX reference matching the PyTorch module semantics."""
    diff = pred.astype(jnp.float32) - target.astype(jnp.float32)
    f = jnp.fft.fft2(diff, norm="ortho")
    fd = jnp.real(f) ** 2 + jnp.imag(f) ** 2
    wgt = jnp.sqrt(fd)
    wgt = wgt / jnp.max(wgt, axis=(-2, -1), keepdims=True)
    wgt = jnp.where(jnp.isnan(wgt), 0.0, wgt)
    wgt = jnp.clip(wgt, 0.0, 1.0)
    ffl = jnp.mean(wgt * fd)
    ad = jnp.abs(diff)
    sl1 = jnp.mean(jnp.where(ad < 1.0, 0.5 * ad * ad, ad - 0.5))
    return ffl + sl1


if __name__ == "__main__":
    key = jax.random.PRNGKey(0)
    k1, k2 = jax.random.split(key)
    N, C, H, W = 2, 4, 16, 16
    pred = jax.random.normal(k1, (N, C, H, W), dtype=jnp.float32)
    target = jax.random.normal(k2, (N, C, H, W), dtype=jnp.float32)

    loss = jax.block_until_ready(focal_freq_l1_loss(pred, target))
    ref = jax.block_until_ready(_reference(pred, target))
    # bf16 two-stage MXU DFT vs jnp.fft f32 reference: small numerics slack.
    np.testing.assert_allclose(np.asarray(loss), np.asarray(ref),
                               rtol=4e-2, atol=2e-3)
    print("KERNEL_OK")
</pallas_src>

<mosaic_0001>
module attributes {stable_mosaic.version = 11 : i64} {
  func.func @_ffl_smoothl1_kernel(%arg0: i32, %arg1: memref<4x16x16xf32, #tpu.memory_space<vmem>>, %arg2: memref<4x16x16xf32, #tpu.memory_space<vmem>>, %arg3: memref<16x16xbf16, #tpu.memory_space<vmem>>, %arg4: memref<16x16xbf16, #tpu.memory_space<vmem>>, %arg5: memref<16x16xbf16, #tpu.memory_space<vmem>>, %arg6: memref<16x16xbf16, #tpu.memory_space<vmem>>, %arg7: memref<1x1x1xf32, #tpu.memory_space<vmem>>) attributes {dimension_semantics = [#tpu.dimension_semantics<parallel>], iteration_bounds = array<i64: 2>, scalar_prefetch = 0 : i64, scratch_operands = 0 : i64, tpu.core_type = #tpu.core_type<tc>, window_params = [{transform_indices = @transform_0, window_bounds = array<i64: 4, 16, 16>}, {transform_indices = @transform_1, window_bounds = array<i64: 4, 16, 16>}, {pipeline_mode = #tpu.pipeline_mode<synchronous>, transform_indices = @transform_2, window_bounds = array<i64: 16, 16>}, {pipeline_mode = #tpu.pipeline_mode<synchronous>, transform_indices = @transform_3, window_bounds = array<i64: 16, 16>}, {pipeline_mode = #tpu.pipeline_mode<synchronous>, transform_indices = @transform_4, window_bounds = array<i64: 16, 16>}, {pipeline_mode = #tpu.pipeline_mode<synchronous>, transform_indices = @transform_5, window_bounds = array<i64: 16, 16>}, {transform_indices = @transform_6, window_bounds = array<i64: 1, 1, 1>}]} {
    %c0 = arith.constant 0 : index
    %c0_0 = arith.constant 0 : index
    %c0_1 = arith.constant 0 : index
    %0 = vector.load %arg1[%c0, %c0_0, %c0_1] : memref<4x16x16xf32, #tpu.memory_space<vmem>>, vector<4x16x16xf32>
    %c0_2 = arith.constant 0 : index
    %c0_3 = arith.constant 0 : index
    %c0_4 = arith.constant 0 : index
    %1 = vector.load %arg2[%c0_2, %c0_3, %c0_4] : memref<4x16x16xf32, #tpu.memory_space<vmem>>, vector<4x16x16xf32>
    %2 = arith.subf %0, %1 : vector<4x16x16xf32>
    %3 = math.absf %2 : vector<4x16x16xf32>
    %cst = arith.constant 1.000000e+00 : f32
    %4 = vector.broadcast %cst : f32 to vector<4x16x16xf32>
    %5 = arith.cmpf olt, %3, %4 : vector<4x16x16xf32>
    %cst_5 = arith.constant 5.000000e-01 : f32
    %6 = vector.broadcast %cst_5 : f32 to vector<4x16x16xf32>
    %7 = arith.mulf %6, %3 : vector<4x16x16xf32>
    %8 = arith.mulf %7, %3 : vector<4x16x16xf32>
    %cst_6 = arith.constant 5.000000e-01 : f32
    %9 = vector.broadcast %cst_6 : f32 to vector<4x16x16xf32>
    %10 = arith.subf %3, %9 : vector<4x16x16xf32>
    %11 = arith.select %5, %8, %10 : vector<4x16x16xi1>, vector<4x16x16xf32>
    %12 = vector.shape_cast %11 : vector<4x16x16xf32> to vector<1x4x16x16xf32>
    %cst_7 = arith.constant dense<0.000000e+00> : vector<1xf32>
    %13 = vector.multi_reduction <add>, %12, %cst_7 [1, 2, 3] : vector<1x4x16x16xf32> to vector<1xf32>
    %14 = vector.shape_cast %13 : vector<1xf32> to vector<1x1x1x1xf32>
    %15 = vector.extract %14[0, 0, 0, 0] : f32 from vector<1x1x1x1xf32>
    %16 = vector.shape_cast %2 : vector<4x16x16xf32> to vector<64x16xf32>
    %17 = arith.truncf %16 : vector<64x16xf32> to vector<64x16xbf16>
    %c0_8 = arith.constant 0 : index
    %c0_9 = arith.constant 0 : index
    %18 = vector.load %arg3[%c0_8, %c0_9] : memref<16x16xbf16, #tpu.memory_space<vmem>>, vector<16x16xbf16>
    %cst_10 = arith.constant dense<0.000000e+00> : vector<64x16xf32>
    %19 = tpu.matmul %17, %18, %cst_10 {dimension_numbers = #tpu.dot_dimension_numbers<[1], [0], [0], [1], [0, 0, 1, 1], [], []>} : vector<64x16xbf16>, vector<16x16xbf16>, vector<64x16xf32> -> vector<64x16xf32>
    %c0_11 = arith.constant 0 : index
    %c0_12 = arith.constant 0 : index
    %20 = vector.load %arg4[%c0_11, %c0_12] : memref<16x16xbf16, #tpu.memory_space<vmem>>, vector<16x16xbf16>
    %cst_13 = arith.constant dense<0.000000e+00> : vector<64x16xf32>
    %21 = tpu.matmul %17, %20, %cst_13 {dimension_numbers = #tpu.dot_dimension_numbers<[1], [0], [0], [1], [0, 0, 1, 1], [], []>} : vector<64x16xbf16>, vector<16x16xbf16>, vector<64x16xf32> -> vector<64x16xf32>
    %22 = vector.shape_cast %19 : vector<64x16xf32> to vector<4x16x16xf32>
    %23 = tpu.transpose %22, [0, 2, 1] : vector<4x16x16xf32> -> vector<4x16x16xf32>
    %24 = vector.shape_cast %23 : vector<4x16x16xf32> to vector<64x16xf32>
    %25 = vector.shape_cast %21 : vector<64x16xf32> to vector<4x16x16xf32>
    %26 = tpu.transpose %25, [0, 2, 1] : vector<4x16x16xf32> -> vector<4x16x16xf32>
    %27 = vector.shape_cast %26 : vector<4x16x16xf32> to vector<64x16xf32>
    %28 = arith.truncf %24 : vector<64x16xf32> to vector<64x16xbf16>
    %29 = arith.truncf %27 : vector<64x16xf32> to vector<64x16xbf16>
    %c0_14 = arith.constant 0 : index
    %c0_15 = arith.constant 0 : index
    %30 = vector.load %arg5[%c0_14, %c0_15] : memref<16x16xbf16, #tpu.memory_space<vmem>>, vector<16x16xbf16>
    %cst_16 = arith.constant dense<0.000000e+00> : vector<64x16xf32>
    %31 = tpu.matmul %28, %30, %cst_16 {dimension_numbers = #tpu.dot_dimension_numbers<[1], [0], [0], [1], [0, 0, 1, 1], [], []>} : vector<64x16xbf16>, vector<16x16xbf16>, vector<64x16xf32> -> vector<64x16xf32>
    %c0_17 = arith.constant 0 : index
    %c0_18 = arith.constant 0 : index
    %32 = vector.load %arg6[%c0_17, %c0_18] : memref<16x16xbf16, #tpu.memory_space<vmem>>, vector<16x16xbf16>
    %cst_19 = arith.constant dense<0.000000e+00> : vector<64x16xf32>
    %33 = tpu.matmul %29, %32, %cst_19 {dimension_numbers = #tpu.dot_dimension_numbers<[1], [0], [0], [1], [0, 0, 1, 1], [], []>} : vector<64x16xbf16>, vector<16x16xbf16>, vector<64x16xf32> -> vector<64x16xf32>
    %c0_20 = arith.constant 0 : index
    %c0_21 = arith.constant 0 : index
    %34 = vector.load %arg5[%c0_20, %c0_21] : memref<16x16xbf16, #tpu.memory_space<vmem>>, vector<16x16xbf16>
    %cst_22 = arith.constant dense<0.000000e+00> : vector<64x16xf32>
    %35 = tpu.matmul %29, %34, %cst_22 {dimension_numbers = #tpu.dot_dimension_numbers<[1], [0], [0], [1], [0, 0, 1, 1], [], []>} : vector<64x16xbf16>, vector<16x16xbf16>, vector<64x16xf32> -> vector<64x16xf32>
    %c0_23 = arith.constant 0 : index
    %c0_24 = arith.constant 0 : index
    %36 = vector.load %arg6[%c0_23, %c0_24] : memref<16x16xbf16, #tpu.memory_space<vmem>>, vector<16x16xbf16>
    %cst_25 = arith.constant dense<0.000000e+00> : vector<64x16xf32>
    %37 = tpu.matmul %28, %36, %cst_25 {dimension_numbers = #tpu.dot_dimension_numbers<[1], [0], [0], [1], [0, 0, 1, 1], [], []>} : vector<64x16xbf16>, vector<16x16xbf16>, vector<64x16xf32> -> vector<64x16xf32>
    %38 = arith.subf %31, %33 : vector<64x16xf32>
    %39 = arith.addf %35, %37 : vector<64x16xf32>
    %40 = arith.mulf %38, %38 : vector<64x16xf32>
    %41 = arith.mulf %39, %39 : vector<64x16xf32>
    %42 = arith.addf %40, %41 : vector<64x16xf32>
    %cst_26 = arith.constant 3.906250e-03 : f32
    %43 = vector.broadcast %cst_26 : f32 to vector<64x16xf32>
    %44 = arith.mulf %42, %43 : vector<64x16xf32>
    %45 = vector.shape_cast %44 : vector<64x16xf32> to vector<4x16x16xf32>
    %cst_27 = arith.constant dense<0xFF800000> : vector<4x16xf32>
    %46 = vector.multi_reduction <maximumf>, %45, %cst_27 [2] : vector<4x16x16xf32> to vector<4x16xf32>
    %47 = vector.shape_cast %46 : vector<4x16xf32> to vector<4x16x1xf32>
    %cst_28 = arith.constant dense<0xFF800000> : vector<4x1xf32>
    %48 = vector.multi_reduction <maximumf>, %47, %cst_28 [1] : vector<4x16x1xf32> to vector<4x1xf32>
    %49 = vector.shape_cast %48 : vector<4x1xf32> to vector<4x1x1xf32>
    %50 = math.sqrt %45 : vector<4x16x16xf32>
    %51 = arith.mulf %45, %50 : vector<4x16x16xf32>
    %cst_29 = arith.constant dense<0.000000e+00> : vector<4x16xf32>
    %52 = vector.multi_reduction <add>, %51, %cst_29 [2] : vector<4x16x16xf32> to vector<4x16xf32>
    %53 = vector.shape_cast %52 : vector<4x16xf32> to vector<4x16x1xf32>
    %cst_30 = arith.constant dense<0.000000e+00> : vector<4x1xf32>
    %54 = vector.multi_reduction <add>, %53, %cst_30 [1] : vector<4x16x1xf32> to vector<4x1xf32>
    %55 = vector.shape_cast %54 : vector<4x1xf32> to vector<4x1x1xf32>
    %cst_31 = arith.constant 0.000000e+00 : f32
    %56 = vector.broadcast %cst_31 : f32 to vector<4x1x1xf32>
    %57 = arith.cmpf ogt, %49, %56 : vector<4x1x1xf32>
    %58 = math.rsqrt %49 : vector<4x1x1xf32>
    %cst_32 = arith.constant 0.000000e+00 : f32
    %59 = vector.broadcast %cst_32 : f32 to vector<4x1x1xf32>
    %60 = arith.select %57, %58, %59 : vector<4x1x1xi1>, vector<4x1x1xf32>
    %61 = arith.mulf %55, %60 : vector<4x1x1xf32>
    %62 = vector.shape_cast %61 : vector<4x1x1xf32> to vector<1x4x1x1xf32>
    %cst_33 = arith.constant dense<0.000000e+00> : vector<1xf32>
    %63 = vector.multi_reduction <add>, %62, %cst_33 [1, 2, 3] : vector<1x4x1x1xf32> to vector<1xf32>
    %64 = vector.shape_cast %63 : vector<1xf32> to vector<1x1x1x1xf32>
    %65 = vector.extract %64[0, 0, 0, 0] : f32 from vector<1x1x1x1xf32>
    %66 = arith.addf %65, %15 : f32
    %67 = vector.broadcast %66 : f32 to vector<1x1x1xf32>
    %c0_34 = arith.constant 0 : index
    %c0_35 = arith.constant 0 : index
    %c0_36 = arith.constant 0 : index
    %68 = vector.load %arg7[%c0_34, %c0_35, %c0_36] : memref<1x1x1xf32, #tpu.memory_space<vmem>>, vector<1x1x1xf32>
    tpu.vector_store %arg7[%c0_34, %c0_35, %c0_36], %67 {strides = array<i32>} : memref<1x1x1xf32, #tpu.memory_space<vmem>>, vector<1x1x1xf32>,
    return
  }
  func.func @transform_0(%arg0: i32) -> (i32, i32, i32) {
    %c0_i32 = arith.constant 0 : i32
    %c0_i32_0 = arith.constant 0 : i32
    %c0_i32_1 = arith.constant 0 : i32
    return %arg0, %c0_i32, %c0_i32_0 : i32, i32, i32
  }
  func.func @transform_1(%arg0: i32) -> (i32, i32, i32) {
    %c0_i32 = arith.constant 0 : i32
    %c0_i32_0 = arith.constant 0 : i32
    %c0_i32_1 = arith.constant 0 : i32
    return %arg0, %c0_i32, %c0_i32_0 : i32, i32, i32
  }
  func.func @transform_2(%arg0: i32) -> (i32, i32) {
    %c0_i32 = arith.constant 0 : i32
    %c0_i32_0 = arith.constant 0 : i32
    %c0_i32_1 = arith.constant 0 : i32
    return %c0_i32, %c0_i32_0 : i32, i32
  }
  func.func @transform_3(%arg0: i32) -> (i32, i32) {
    %c0_i32 = arith.constant 0 : i32
    %c0_i32_0 = arith.constant 0 : i32
    %c0_i32_1 = arith.constant 0 : i32
    return %c0_i32, %c0_i32_0 : i32, i32
  }
  func.func @transform_4(%arg0: i32) -> (i32, i32) {
    %c0_i32 = arith.constant 0 : i32
    %c0_i32_0 = arith.constant 0 : i32
    %c0_i32_1 = arith.constant 0 : i32
    return %c0_i32, %c0_i32_0 : i32, i32
  }
  func.func @transform_5(%arg0: i32) -> (i32, i32) {
    %c0_i32 = arith.constant 0 : i32
    %c0_i32_0 = arith.constant 0 : i32
    %c0_i32_1 = arith.constant 0 : i32
    return %c0_i32, %c0_i32_0 : i32, i32
  }
  func.func @transform_6(%arg0: i32) -> (i32, i32, i32) {
    %c0_i32 = arith.constant 0 : i32
    %c0_i32_0 = arith.constant 0 : i32
    %c0_i32_1 = arith.constant 0 : i32
    return %arg0, %c0_i32, %c0_i32_0 : i32, i32, i32
  }
}

</mosaic_0001>

<bundles_post_ra>
// kernel: tpu_custom_call.1
= control target key start
LH: loop header
LB: loop body
LE: loop exit
PB: predicated region body
PF: predicated region fallthrough
CT: control target
= control target key end

     0   :  { %11 = vsyncpa [#allocation3], 0  ;;  %s2484_s0 = inlined_call_operand.hbm [shape: f32[8,16,16], index: 0, kind: input, shape index: {}]   ;;  %s2485_s1 = inlined_call_operand.hbm [shape: f32[8,16,16], index: 1, kind: input, shape index: {}]   ;;  %s2486_s2 = inlined_call_operand.hbm [shape: bf16[16,16], index: 2, kind: input, shape index: {}]   ;;  %s2487_s3 = inlined_call_operand.vmem [shape: bf16[16,16], index: 3, kind: input, shape index: {}]   ;;  %s2488_s4 = inlined_call_operand.hbm [shape: bf16[16,16], index: 4, kind: input, shape index: {}]   ;;  %s2489_s5 = inlined_call_operand.vmem [shape: bf16[16,16], index: 5, kind: input, shape index: {}]   ;;  %s2490_s6 = inlined_call_operand.vmem [shape: f32[2,1,1], index: 6, kind: output, shape index: {}]  }
   0x1   :  { %13 = vsyncpa [#allocation3 + $0x1], 0 }
   0x2   :  { %14 = vsyncpa [#allocation5], 0 }
   0x3   :  { %16 = vsyncpa [#allocation5 + $0x1], 0 }
   0x4   :  { %17 = vsyncpa [#allocation8], 0  ;;  %s2033_s21 = smov 0   ;;  %s2035_s22 = smov 0  }
   0x5   :  { %s2037_s23 = smov 0   ;;  %s2039_s24 = smov 0  }
   0x6 LB: > { %s2052_s25 = sadd.s32 4294967295, %s1988_s24   ;;  %p43_p0 = scmp.ne.s32.totalorder %s1980_s22, %s1976_s21  ;;  %s1988_s24 = sphi %s2039_s24, %s2507_s24   ;;  %s1984_s23 = sphi %s2037_s23, %s2506_s23   ;;  %s1980_s22 = sphi %s2035_s22, %s2505_s22   ;;  %s1976_s21 = sphi %s2033_s21, %s2504_s21  }
   0x7   : > { %p2491_p1 = scmp.eq.s32.totalorder %s2052_s25, 0  ;;  %p1511_p2 = scmp.ge.s32.totalorder %s1988_s24, 1 }
   0x8   : > { %p190_p3 = scmp.lt.s32.totalorder %s1988_s24, 3  ;;  %s1990_s28 = smov [#allocation6]  }
   0x9   : > { %p2060_p4 = por %p2491_p1, %p43_p0  ;;  %s202_s29 = sshll.u32 %s1990_s28, 4  ;;  %s203_s29 = int_to_ptr.vmem [resolvable:$true] %s202_s29 }
   0xa   : > { %p2064_p5 = pnand %p1511_p2, %p190_p3  ;;  %s1991_s7 = smov [#allocation7]  }
   0xb   : > { %s2494_s26 = scalar_select %p2060_p4, 1, 0 }
   0xc   : > { %s2495_s27 = scalar_select %p2064_p5, 1, 0 }
   0xd   : > { %p1684_p6 = pneg %p2064_p5  ;;  %s218_s8 = sshll.u32 %s1991_s7, 4  ;;  %s2076_s8 = int_to_ptr.vmem [resolvable:$true] %s218_s8 }
   0xe   : > { %s1826_s11 = scalar_lea.hbm %s2486_s2, 128 }
   0xf   : > { %p2072_p7 = pnand %p1684_p6, %p2491_p1  ;;  %p1827_p8 = scmp.ne.s32.totalorder %s2486_s2, %s1826_s11 }
  0x10   : > { %p1833_p12 = scmp.lt.u32.totalorder %s1826_s11, %s2486_s2 }
  0x11   : > { %p1828_p9 = pneg %p2072_p7 }
  0x13   : > { %p1829_p10 = pnand %p1828_p9, %p1827_p8 }
  0x15   : > { %p1830_p11 = pneg %p1829_p10 }
  0x17   : > { %p1835_p13 = pnand %p1833_p12, %p1830_p11 }
  0x19   : > { %1838 = shalt.err (!%p1835_p13)
}
  0x1a   : > { %s1839_s16 = scalar_lea.vmem %s203_s29, 128  ;;  %p1847_p6 = scmp.lt.s32.totalorder %s203_s29, %s203_s29 }
  0x1b   : > { %p1840_p0 = scmp.ne.s32.totalorder %s203_s29, %s1839_s16  ;;  %p1848_p1 = scmp.lt.s32.totalorder %s1839_s16, %s1839_s16 }
  0x1d   : > { %p1842_p2 = pnand %p1840_p0, %p1828_p9  ;;  %p1849_p4 = por %p1848_p1, %p1847_p6 }
  0x1f   : > { %p1843_p3 = pneg %p1842_p2 }
  0x21   : > { %p1850_p5 = pnand %p1849_p4, %p1843_p3 }
  0x23   : > { %1853 = shalt.err (!%p1850_p5)
}
  0x24   : > { %s1992_s17 = smov 64   ;;  %s1993_s18 = smov 4  }
  0x25   : > { %1687 = dma.hbm_to_vmem [thread:$0]  (!%p2072_p7), %s2486_s2, 128, %s203_s29, [#allocation5], %s1992_s17, %s1992_s17, %s1993_s18  }
  0x26   : > { %s1854_s7 = scalar_lea.hbm %s2488_s4, 128 }
  0x27   : > { %p1855_p8 = scmp.ne.s32.totalorder %s2488_s4, %s1854_s7  ;;  %p1861_p5 = scmp.lt.u32.totalorder %s1854_s7, %s2488_s4 }
  0x29   : > { %p1857_p1 = pnand %p1855_p8, %p1828_p9 }
  0x2b   : > { %p1858_p4 = pneg %p1857_p1 }
  0x2d   : > { %p1863_p10 = pnand %p1861_p5, %p1858_p4 }
  0x2f   : > { %1866 = shalt.err (!%p1863_p10)
}
  0x30   : > { %s1867_s29 = scalar_lea.vmem %s2076_s8, 128  ;;  %p1875_p0 = scmp.lt.s32.totalorder %s2076_s8, %s2076_s8 }
  0x31   : > { %p1868_p11 = scmp.ne.s32.totalorder %s2076_s8, %s1867_s29  ;;  %p1876_p2 = scmp.lt.s32.totalorder %s1867_s29, %s1867_s29 }
  0x33   : > { %p1870_p12 = pnand %p1868_p11, %p1828_p9  ;;  %p1877_p3 = por %p1876_p2, %p1875_p0 }
  0x35   : > { %p1871_p13 = pneg %p1870_p12 }
  0x37   : > { %p1878_p6 = pnand %p1877_p3, %p1871_p13 }
  0x39   : > { %1881 = shalt.err (!%p1878_p6)
}
  0x3a   : > { %1690 = dma.hbm_to_vmem [thread:$0]  (!%p2072_p7), %s2488_s4, 128, %s2076_s8, [#allocation8], %s1992_s17, %s1992_s17, %s1993_s18  }
  0x3b   : > { %s2126_s15 = sadd.s32 1, %s1988_s24   ;;  %s30_s30 = sadd.s32 1, %s1984_s23 }
  0x3c   : > { %s27_s16 = ssub.s32 %s1988_s24, %s2126_s15  ;;  %p37_p9 = scmp.ne.s32.totalorder %s1984_s23, %s1980_s22 }
  0x3d   : > { %p28_p8 = scmp.eq.s32.totalorder %s27_s16, 0  ;;  %p38_p1 = scmp.eq.s32.totalorder %s1988_s24, 0 }
  0x3e   : > { %p1700_p4 = scmp.lt.s32.totalorder %s1988_s24, 2  ;;  %s235_s19 = sand.u32 1, %s1984_s23  }
  0x3f   : > { %s2137_s20 = scalar_select %p28_p8, %s1984_s23, %s30_s30  }
  0x40   : > { %p39_p5 = por %p38_p1, %p37_p9  ;;  %s2139_s21 = sshll.u32 %s235_s19, 6 }
  0x41   : > { %s1567_s28 = sshll.u32 %s1988_s24, 10  ;;  %s239_s18 = scalar_lea.vmem [#allocation2], %s2139_s21 }
  0x42   : > { %s2147_s17 = scalar_lea.hbm %s2484_s0, %s1567_s28  ;;  %s247_s9 = sshll.u32 %s239_s18, 4  ;;  %s2154_s9 = int_to_ptr.vmem [resolvable:$true] %s247_s9 }
  0x43   : > { %p2150_p7 = pnand %p1700_p4, %p39_p5  ;;  %s2156_s11 = scalar_lea.sflag [#allocation3], %s235_s19 }
  0x44   : > { %s1882_s12 = scalar_lea.hbm %s2147_s17, 1024  ;;  %s1887_s14 = scalar_lea.hbm %s2484_s0, 2048 }
  0x45   : > { %p1883_p10 = scmp.ne.s32.totalorder %s2147_s17, %s1882_s12  ;;  %p1884_p11 = pneg %p2150_p7 }
  0x46   : > { %p1888_p0 = scmp.lt.u32.totalorder %s2147_s17, %s2484_s0  ;;  %p1889_p2 = scmp.lt.u32.totalorder %s1887_s14, %s1882_s12 }
  0x47   : > { %p1885_p12 = pnand %p1884_p11, %p1883_p10  ;;  %p1891_p6 = scmp.lt.u32.totalorder %s1882_s12, %s2147_s17 }
  0x48   : > { %p1890_p3 = por %p1889_p2, %p1888_p0 }
  0x49   : > { %p1886_p13 = pneg %p1885_p12 }
  0x4a   : > { %p1892_p9 = por %p1891_p6, %p1890_p3 }
  0x4c   : > { %p1893_p8 = pnand %p1892_p9, %p1886_p13 }
  0x4e   : > { %1896 = shalt.err (!%p1893_p8)
}
  0x4f   : > { %s1897_s19 = scalar_lea.vmem %s2154_s9, 1024  ;;  %s1994_s7 = smov [#allocation2]  }
  0x50   : > { %p1898_p1 = scmp.ne.s32.totalorder %s2154_s9, %s1897_s19  ;;  %s1902_s8 = sshll.u32 %s1994_s7, 4  ;;  %s1903_s8 = int_to_ptr.vmem [resolvable:$false] %s1902_s8 }
  0x51   : > { %s1904_s18 = scalar_lea.vmem %s1903_s8, 2048  ;;  %p1905_p10 = scmp.lt.s32.totalorder %s2154_s9, %s1903_s8 }
  0x52   : > { %p1900_p4 = pnand %p1898_p1, %p1884_p11  ;;  %p1906_p12 = scmp.lt.s32.totalorder %s1904_s18, %s1897_s19 }
  0x54   : > { %p1901_p5 = pneg %p1900_p4  ;;  %p1907_p0 = por %p1906_p12, %p1905_p10 }
  0x56   : > { %p1908_p2 = pnand %p1907_p0, %p1901_p5 }
  0x58   : > { %1911 = shalt.err (!%p1908_p2)
}
  0x59   : > { %s1995_s12 = smov 128   ;;  %s1996_s29 = smov 8  }
  0x5a   : > { %1694 = dma.hbm_to_vmem [thread:$0]  (!%p2150_p7), %s2147_s17, 1024, %s2154_s9, %s2156_s11, %s1995_s12, %s1995_s12, %s1996_s29  }
  0x5b   : > { %s2192_s30 = scalar_lea.hbm %s2485_s1, %s1567_s28  ;;  %s261_s16 = scalar_lea.vmem [#allocation4], %s2139_s21 }
  0x5c   : > { %s269_s19 = sshll.u32 %s261_s16, 4  ;;  %s257_s7 = sand.u32 1, %s1988_s24   ;;  %s2196_s19 = int_to_ptr.vmem [resolvable:$true] %s269_s19 }
  0x5d   : > { %s2198_s8 = scalar_lea.sflag [#allocation5], %s257_s7  ;;  %s1912_s18 = scalar_lea.hbm %s2192_s30, 1024 }
  0x5e   : > { %p1913_p13 = scmp.ne.s32.totalorder %s2192_s30, %s1912_s18  ;;  %s1917_s9 = scalar_lea.hbm %s2485_s1, 2048 }
  0x5f   : > { %p1918_p9 = scmp.lt.u32.totalorder %s2192_s30, %s2485_s1  ;;  %p1919_p8 = scmp.lt.u32.totalorder %s1917_s9, %s1912_s18 }
  0x60   : > { %p1915_p3 = pnand %p1913_p13, %p1884_p11  ;;  %p1921_p4 = scmp.lt.u32.totalorder %s1912_s18, %s2192_s30 }
  0x61   : > { %p1920_p1 = por %p1919_p8, %p1918_p9 }
  0x62   : > { %p1916_p6 = pneg %p1915_p3 }
  0x63   : > { %p1922_p5 = por %p1921_p4, %p1920_p1 }
  0x65   : > { %p1923_p10 = pnand %p1922_p5, %p1916_p6 }
  0x67   : > { %1926 = shalt.err (!%p1923_p10)
}
  0x68   : > { %s1927_s24 = scalar_lea.vmem %s2196_s19, 1024  ;;  %s1997_s21 = smov [#allocation4]  }
  0x69   : > { %p1928_p12 = scmp.ne.s32.totalorder %s2196_s19, %s1927_s24  ;;  %s1932_s14 = sshll.u32 %s1997_s21, 4  ;;  %s1933_s14 = int_to_ptr.vmem [resolvable:$false] %s1932_s14 }
  0x6a   : > { %s1934_s16 = scalar_lea.vmem %s1933_s14, 2048  ;;  %p1935_p13 = scmp.lt.s32.totalorder %s2196_s19, %s1933_s14 }
  0x6b   : > { %p1930_p0 = pnand %p1928_p12, %p1884_p11  ;;  %p1936_p3 = scmp.lt.s32.totalorder %s1934_s16, %s1927_s24 }
  0x6d   : > { %p1931_p2 = pneg %p1930_p0  ;;  %p1937_p9 = por %p1936_p3, %p1935_p13 }
  0x6f   : > { %p1938_p8 = pnand %p1937_p9, %p1931_p2 }
  0x71   : > { %1941 = shalt.err (!%p1938_p8)
}
  0x72   : > { %1697 = dma.hbm_to_vmem [thread:$0]  (!%p2150_p7), %s2192_s30, 1024, %s2196_s19, %s2198_s8, %s1995_s12, %s1995_s12, %s1996_s29  }
  0x73   : > { %p2498_p11 = scmp.ne.s32.totalorder %s2495_s27, 0 }
  0x74   : > { %s283_s7 = sand.u32 (!%p2498_p11), 1, %s1980_s22   ;;  %p2499_p6 = scmp.ne.s32.totalorder (!%p2498_p11), %s2494_s26, 0 }
  0x75   : > { %281 = sbr.rel (%p2498_p11) target bundleno = 1148 (0x47c), region = 44  ;;  %s1524_s18 = sshll.u32 (!%p2498_p11), %s283_s7, 6 }
  0x76   : > { %s284_s17 = scalar_lea.sflag (!%p2498_p11), [#allocation3], %s283_s7  ;;  %s2230_s28 = scalar_lea.vmem (!%p2498_p11), [#allocation2], %s1524_s18 }
  0x7c   : > { %1959 = dma.done.wait (%p2499_p6), %s284_s17, 1024  }
  0x7d   : > { %1961 = vsyncadd (%p2499_p6), %s284_s17, 4294966272  ;;  %s292_s10 = sand.u32 1, %s2052_s25   ;;  %s2237_s12 = scalar_lea.vmem [#allocation4], %s1524_s18 }
  0x7e   : > { %s293_s9 = scalar_lea.sflag [#allocation5], %s292_s10 }
  0x7f   : > { %1963 = dma.done.wait (%p2499_p6), %s293_s9, 1024  }
  0x80   : > { %1965 = vsyncadd (%p2499_p6), %s293_s9, 4294966272  ;;  %p2500_p7 = scmp.eq.s32.totalorder %s2052_s25, 0 }
  0x82   : > { %1967 = dma.done.wait (%p2500_p7), [#allocation5], 128   ;;  %p2501_p1 = pmov %p2500_p7 }
  0x84   : > { %1969 = vsyncadd (%p2501_p1), [#allocation5], 4294967168  ;;  %p2502_p4 = pmov %p2501_p1 }
  0x85   : > { %p2503_p5 = pmov %p2501_p1 }
  0x86   : > { %1971 = dma.done.wait (%p2502_p4), [#allocation8], 128  }
  0x87   : > { %1973 = vsyncadd (%p2503_p5), [#allocation8], 4294967168  ;;  %v1798_v0 = vld [vmem:[#allocation6] sm:$0xff]   ;;  %v343_v2 = vld [vmem:[%s2230_s28 + $0x8] sm:$0xff]  ;;  %vm414_vm0 = vcmask 130048   ;;  %p338_p10 = scmp.lt.s32.totalorder %s2052_s25, 1 }
  0x88   : > { %v342_v1 = vld [vmem:[%s2230_s28] sm:$0xff]  ;;  %1600 = vmatprep.subr.bf16.mxu1 %v1798_v0  ;;  %v351_v4 = vld [vmem:[%s2237_s12 + $0x8] sm:$0xff]  ;;  %v344_v6 = vld [vmem:[%s2230_s28 + $0x10] sm:$0xff] }
  0x89   : > { %v350_v3 = vld [vmem:[%s2237_s12] sm:$0xff]  ;;  %v345_v7 = vld [vmem:[%s2230_s28 + $0x18] sm:$0xff]  ;;  %1601 = vmatpush3.bf16.msra.mxu1 %v1798_v0  ;;  %v2259_v8 = vsub.f32 %v343_v2, %v351_v4  ;;  %v352_v9 = vld [vmem:[%s2237_s12 + $0x10] sm:$0xff]  ;;  %s2509_s25 = smov (!%p338_p10, %s2052_s25), 1 }
  0x8a   : > { %v2255_v5 = vsub.f32 %v342_v1, %v350_v3  ;;  %v353_v10 = vld [vmem:[%s2237_s12 + $0x18] sm:$0xff]  ;;  %v346_v11 = vld [vmem:[%s2230_s28 + $0x20] sm:$0xff]  ;;  %v2264_v12 = vsub.f32 %v344_v6, %v352_v9  ;;  %v347_v14 = vld [vmem:[%s2230_s28 + $0x28] sm:$0xff]  ;;  %s340_s24 = scalar_lea.vmem %s2490_s6, %s2509_s25 }
  0x8b   : > { %v2266_v13 = vsub.f32 %v345_v7, %v353_v10  ;;  %v354_v15 = vld [vmem:[%s2237_s12 + $0x20] sm:$0xff]  ;;  %v355_v16 = vld [vmem:[%s2237_s12 + $0x28] sm:$0xff]  ;;  %v348_v20 = vld [vmem:[%s2230_s28 + $0x30] sm:$0xff] }
  0x8c   : > { %v439_v17 = vpack.c.bf16 %v2259_v8, %v2255_v5  ;;  %v2273_v18 = vsub.f32 %v346_v11, %v354_v15  ;;  %v2275_v19 = vsub.f32 %v347_v14, %v355_v16  ;;  %v349_v21 = vld [vmem:[%s2230_s28 + $0x38] sm:$0xff]  ;;  %v356_v22 = vld [vmem:[%s2237_s12 + $0x30] sm:$0xff]  ;;  %v1799_v24 = vld [vmem:[%s2487_s3] sm:$0xff]  }
  0x8d   : > { %v357_v23 = vld [vmem:[%s2237_s12 + $0x38] sm:$0xff]  ;;  %v440_v25 = vpack.c.bf16 %v2266_v13, %v2264_v12  ;;  %1610 = vmatprep.subr.bf16.mxu1 %v1799_v24  ;;  %v2290_v27 = vsub.f32 %v348_v20, %v356_v22  ;;  %v2302_v37 = vld [vmem:[#allocation7] sm:$0xff]   ;;  %v1801_v43 = vld [vmem:[%s2489_s5] sm:$0xff]  }
  0x8e   : > { %1602 = vmatprep.mubr.msk.bf16.mxu1 %vm414_vm0, %v439_v17  ;;  %v441_v26 = vpack.c.bf16 %v2275_v19, %v2273_v18  ;;  %v2292_v28 = vsub.f32 %v349_v21, %v357_v23  ;;  %1620 = vmatprep.subr.bf16.mxu0 %v2302_v37 }
  0x8f   : > { %1603 = vmatmul.mubr.msk.bf16.vlgmr.msra.gmra.mrb[0].mxu1 %vm414_vm0, %v440_v25  ;;  %1621 = vmatpush3.bf16.msra.mxu0 %v2302_v37 }
  0x90   : > { %1606 = vmatprep.mubr.msk.bf16.mxu1 %vm414_vm0, %v441_v26  ;;  %1611 = vmatpush3.bf16.msra.mxu1 %v1799_v24  ;;  %v442_v29 = vpack.c.bf16 %v2292_v28, %v2290_v27 }
  0x91   : > { %1640 = vmatprep.subr.bf16.mxu0 %v1801_v43  ;;  %1630 = vmatprep.subr.bf16.mxu1 %v1801_v43 }
  0x97   : > { %1607 = vmatmul.mubr.msk.bf16.gmra.mrb[4].mxu1 %vm414_vm0, %v442_v29 }
  0x98   : > { %1612 = vmatprep.mubr.msk.bf16.mxu1 %vm414_vm0, %v439_v17 }
  0x9f   : > { %1613 = vmatmul.mubr.msk.bf16.vlgmr.msra.gmra.mrb[8].mxu1 %vm414_vm0, %v440_v25 }
  0xa0   : > { %1616 = vmatprep.mubr.msk.bf16.mxu1 %vm414_vm0, %v441_v26  ;;  %1631 = vmatpush3.bf16.msra.mxu1 %v1801_v43 }
  0xa7   : > { %1617 = vmatmul.mubr.msk.bf16.gmra.mrb[12].mxu1 %vm414_vm0, %v442_v29 }
 0x162   : > { %v1604_v30 = vpop.f32.mrb[0].mxu1 }
 0x163   : > { %v497_v31 = vpop.f32.mrb[1].mxu1 }
 0x164   : > { %v1605_v32 = vpop.f32.mrb[2].mxu1  ;;  %v1742_v33 = vpack.i.bf16 %v1604_v30, %v497_v31 }
 0x165   : > { %v500_v34 = vpop.f32.mrb[3].mxu1 }
 0x166   : > { %v1744_v35 = vpack.i.bf16 %v1605_v32, %v500_v34  ;;  %1743 = vxpose.xlu0.b32.start [1/2] (short) (narrow) %v1742_v33, 16 }
 0x16a   : > { %1745 = vxpose.xlu0.b32.end [2/2] (short) (narrow) %v1744_v35, 16  ;;  %v1608_v36 = vpop.f32.mrb[4].mxu1 }
 0x16b   : > { %v513_v38 = vpop.f32.mrb[5].mxu1 }
 0x16c   : > { %v1609_v39 = vpop.f32.mrb[6].mxu1  ;;  %v1756_v40 = vpack.i.bf16 %v1608_v36, %v513_v38 }
 0x16d   : > { %v516_v41 = vpop.f32.mrb[7].mxu1 }
 0x16e   : > { %v1758_v42 = vpack.i.bf16 %v1609_v39, %v516_v41  ;;  %1757 = vxpose.xlu1.b32.start [1/2] (short) (narrow) %v1756_v40, 16 }
 0x172   : > { %1759 = vxpose.xlu1.b32.end [2/2] (short) (narrow) %v1758_v42, 16  ;;  %v1614_v44 = vpop.f32.mrb[8].mxu1 }
 0x173   : > { %v570_v45 = vpop.f32.mrb[9].mxu1 }
 0x174   : > { %v1770_v46 = vpack.i.bf16 %v1614_v44, %v570_v45  ;;  %v1615_v47 = vpop.f32.mrb[10].mxu1 }
 0x175   : > { %v573_v48 = vpop.f32.mrb[11].mxu1 }
 0x176   : > { %1771 = vxpose.xlu0.b32.start [1/2] (short) (narrow) %v1770_v46, 16  ;;  %v1772_v49 = vpack.i.bf16 %v1615_v47, %v573_v48 }
 0x17a   : > { %1773 = vxpose.xlu0.b32.end [2/2] (short) (narrow) %v1772_v49, 16  ;;  %v1618_v50 = vpop.f32.mrb[12].mxu1 }
 0x17b   : > { %v586_v51 = vpop.f32.mrb[13].mxu1 }
 0x17c   : > { %v1784_v52 = vpack.i.bf16 %v1618_v50, %v586_v51  ;;  %v1619_v53 = vpop.f32.mrb[14].mxu1 }
 0x17d   : > { %v589_v54 = vpop.f32.mrb[15].mxu1 }
 0x17e   : > { %1785 = vxpose.xlu1.b32.start [1/2] (short) (narrow) %v1784_v52, 16  ;;  %v1786_v55 = vpack.i.bf16 %v1619_v53, %v589_v54 }
 0x182   : > { %1787 = vxpose.xlu1.b32.end [2/2] (short) (narrow) %v1786_v55, 16 }
 0x1e6   : > { %v1746_v56 = vpop.trf.xlu0 }
 0x1e7   : > { %v1750_v57 = vunpack.i.h.bf16 %v1746_v56  ;;  %v1747_v59 = vunpack.i.l.bf16 %v1746_v56 }
 0x1ea   : > { %v1751_v58 = vpop.trf.xlu0 }
 0x1eb   : > { %v1755_v60 = vunpack.i.h.bf16 %v1751_v58  ;;  %v1752_v61 = vunpack.i.l.bf16 %v1751_v58 }
 0x1ed   : > { %v857_v62 = vpack.c.bf16 %v1752_v61, %v1747_v59  ;;  %v858_v63 = vpack.c.bf16 %v1755_v60, %v1750_v57 }
 0x1ee   : > { %v1760_v0 = vpop.trf.xlu1 }
 0x1ef   : > { %1622 = vmatprep.mubr.msk.bf16.mxu0 %vm414_vm0, %v857_v62  ;;  %v1764_v1 = vunpack.i.h.bf16 %v1760_v0  ;;  %v1761_v2 = vunpack.i.l.bf16 %v1760_v0 }
 0x1f0   : > { %1623 = vmatmul.mubr.msk.bf16.vlgmr.msra.gmra.mrb[0].mxu0 %vm414_vm0, %v858_v63 }
 0x1f1   : > { %1641 = vmatpush3.bf16.msra.mxu0 %v1801_v43 }
 0x1f2   : > { %v1765_v3 = vpop.trf.xlu1  ;;  %1650 = vmatprep.subr.bf16.mxu0 %v2302_v37 }
 0x1f3   : > { %v1769_v4 = vunpack.i.h.bf16 %v1765_v3  ;;  %v1766_v6 = vunpack.i.l.bf16 %v1765_v3 }
 0x1f5   : > { %v859_v7 = vpack.c.bf16 %v1766_v6, %v1761_v2  ;;  %v860_v9 = vpack.c.bf16 %v1769_v4, %v1764_v1 }
 0x1f6   : > { %v1774_v10 = vpop.trf.xlu0 }
 0x1f7   : > { %1626 = vmatprep.mubr.msk.bf16.mxu0 %vm414_vm0, %v859_v7  ;;  %v1778_v11 = vunpack.i.h.bf16 %v1774_v10  ;;  %v1775_v14 = vunpack.i.l.bf16 %v1774_v10 }
 0x1f8   : > { %1627 = vmatmul.mubr.msk.bf16.gmra.mrb[4].mxu0 %vm414_vm0, %v860_v9 }
 0x1f9   : > { %1642 = vmatprep.mubr.msk.bf16.mxu0 %vm414_vm0, %v857_v62 }
 0x1fa   : > { %v1779_v15 = vpop.trf.xlu0 }
 0x1fb   : > { %v1783_v16 = vunpack.i.h.bf16 %v1779_v15  ;;  %v1780_v17 = vunpack.i.l.bf16 %v1779_v15 }
 0x1fd   : > { %v862_v20 = vpack.c.bf16 %v1783_v16, %v1778_v11  ;;  %v861_v21 = vpack.c.bf16 %v1780_v17, %v1775_v14 }
 0x1fe   : > { %v1788_v22 = vpop.trf.xlu1 }
 0x1ff   : > { %1632 = vmatprep.mubr.msk.bf16.mxu1 %vm414_vm0, %v861_v21  ;;  %v1792_v23 = vunpack.i.h.bf16 %v1788_v22  ;;  %v1789_v24 = vunpack.i.l.bf16 %v1788_v22 }
 0x200   : > { %1633 = vmatmul.mubr.msk.bf16.vlgmr.msra.gmra.mrb[16].mxu1 %vm414_vm0, %v862_v20  ;;  %1643 = vmatmul.mubr.msk.bf16.vlgmr.msra.gmra.mrb[8].mxu0 %vm414_vm0, %v858_v63 }
 0x201   : > { %1651 = vmatpush3.bf16.msra.mxu0 %v2302_v37  ;;  %1646 = vmatprep.mubr.msk.bf16.mxu0 %vm414_vm0, %v859_v7 }
 0x202   : > { %v1793_v25 = vpop.trf.xlu1 }
 0x203   : > { %v1797_v26 = vunpack.i.h.bf16 %v1793_v25  ;;  %v1794_v29 = vunpack.i.l.bf16 %v1793_v25 }
 0x205   : > { %v863_v30 = vpack.c.bf16 %v1794_v29, %v1789_v24  ;;  %v864_v31 = vpack.c.bf16 %v1797_v26, %v1792_v23 }
 0x207   : > { %1636 = vmatprep.mubr.msk.bf16.mxu1 %vm414_vm0, %v863_v30 }
 0x208   : > { %1637 = vmatmul.mubr.msk.bf16.gmra.mrb[20].mxu1 %vm414_vm0, %v864_v31  ;;  %1647 = vmatmul.mubr.msk.bf16.gmra.mrb[12].mxu0 %vm414_vm0, %v860_v9 }
 0x209   : > { %1652 = vmatprep.mubr.msk.bf16.mxu0 %vm414_vm0, %v861_v21 }
 0x210   : > { %1653 = vmatmul.mubr.msk.bf16.vlgmr.msra.gmra.mrb[8].mxu0 %vm414_vm0, %v862_v20 }
 0x211   : > { %1656 = vmatprep.mubr.msk.bf16.mxu0 %vm414_vm0, %v863_v30 }
 0x218   : > { %1657 = vmatmul.mubr.msk.bf16.gmra.mrb[12].mxu0 %vm414_vm0, %v864_v31 }
 0x2c3   : > { %v1624_v32 = vpop.f32.mrb[0].mxu0 }
 0x2c4   : > { %v919_v33 = vpop.f32.mrb[1].mxu0 }
 0x2c5   : > { %v1625_v34 = vpop.f32.mrb[2].mxu0 }
 0x2c6   : > { %v922_v35 = vpop.f32.mrb[3].mxu0 }
 0x2cb   : > { %v1628_v36 = vpop.f32.mrb[4].mxu0 }
 0x2cc   : > { %v935_v37 = vpop.f32.mrb[5].mxu0 }
 0x2cd   : > { %v1629_v38 = vpop.f32.mrb[6].mxu0 }
 0x2ce   : > { %v938_v39 = vpop.f32.mrb[7].mxu0 }
 0x2d3   : > { %v1634_v40 = vpop.f32.mrb[16].mxu1 }
 0x2d4   : > { %v1102_v41 = vsub.f32 %v1624_v32, %v1634_v40  ;;  %v1004_v42 = vpop.f32.mrb[17].mxu1 }
 0x2d5   : > { %v1100_v43 = vsub.f32 %v919_v33, %v1004_v42  ;;  %v1635_v44 = vpop.f32.mrb[18].mxu1 }
 0x2d6   : > { %v1103_v45 = vsub.f32 %v1625_v34, %v1635_v44  ;;  %v1007_v46 = vpop.f32.mrb[19].mxu1  ;;  %v1175_v57 = vmul.f32 %v1102_v41, %v1102_v41 }
 0x2d7   : > { %v1101_v47 = vsub.f32 %v922_v35, %v1007_v46  ;;  %v1173_v60 = vmul.f32 %v1100_v43, %v1100_v43 }
 0x2d8   : > { %v1176_v63 = vmul.f32 %v1103_v45, %v1103_v45 }
 0x2d9   : > { %v1174_v3 = vmul.f32 %v1101_v47, %v1101_v47 }
 0x2db   : > { %v1638_v48 = vpop.f32.mrb[20].mxu1 }
 0x2dc   : > { %v1106_v49 = vsub.f32 %v1628_v36, %v1638_v48  ;;  %v1020_v50 = vpop.f32.mrb[21].mxu1 }
 0x2dd   : > { %v1104_v51 = vsub.f32 %v935_v37, %v1020_v50  ;;  %v1639_v52 = vpop.f32.mrb[22].mxu1 }
 0x2de   : > { %v1107_v53 = vsub.f32 %v1629_v38, %v1639_v52  ;;  %v1023_v54 = vpop.f32.mrb[23].mxu1  ;;  %v1179_v20 = vmul.f32 %v1106_v49, %v1106_v49 }
 0x2df   : > { %v1105_v55 = vsub.f32 %v938_v39, %v1023_v54  ;;  %v1177_v24 = vmul.f32 %v1104_v51, %v1104_v51 }
 0x2e0   : > { %v1180_v25 = vmul.f32 %v1107_v53, %v1107_v53 }
 0x2e1   : > { %v1178_v34 = vmul.f32 %v1105_v55, %v1105_v55 }
 0x2e3   : > { %v1654_v56 = vpop.f32.mrb[8].mxu0 }
 0x2e4   : > { %v1183_v58 = vmul.f32 %v1654_v56, %v1654_v56  ;;  %v1142_v59 = vpop.f32.mrb[9].mxu0 }
 0x2e5   : > { %v1181_v61 = vmul.f32 %v1142_v59, %v1142_v59  ;;  %v1655_v62 = vpop.f32.mrb[10].mxu0 }
 0x2e6   : > { %v1191_v0 = vadd.f32 %v1183_v58, %v1175_v57  ;;  %v1184_v1 = vmul.f32 %v1655_v62, %v1655_v62  ;;  %v1145_v2 = vpop.f32.mrb[11].mxu0 }
 0x2e7   : > { %v1189_v4 = vadd.f32 %v1181_v61, %v1173_v60  ;;  %v1182_v6 = vmul.f32 %v1145_v2, %v1145_v2 }
 0x2e8   : > { %v2327_v7 = vmul.f32 0.00390625, %v1191_v0  ;;  %v1192_v9 = vadd.f32 %v1184_v1, %v1176_v63 }
 0x2e9   : > { %v2329_v10 = vmul.f32 0.00390625, %v1189_v4  ;;  %v1190_v11 = vadd.f32 %v1182_v6, %v1174_v3 }
 0x2ea   : > { %v2331_v14 = vmul.f32 0.00390625, %v1192_v9  ;;  %v1211_v15 = vsel %vm414_vm0, %v2327_v7, -inf  ;;  %1802 = vrsqrt.f32 %v2327_v7  ;;  %vm1273_vm1 = vcmp.eq.f32.partialorder %v2327_v7, inf }
 0x2eb   : > { %v1658_v16 = vpop.f32.mrb[12].mxu0  ;;  %1212 = vmax.xlane.f32.xlu1 %v1211_v15  ;;  %v1205_v17 = vsel %vm414_vm0, %v2329_v10, -inf  ;;  %v2338_v21 = vmul.f32 0.00390625, %v1190_v11  ;;  %vm1275_vm2 = vcmp.eq.f32.partialorder %v2327_v7, 0.0  ;;  %v1276_v47 = vand.u32 2147483648, %v2327_v7 }
 0x2ec   : > { %v1187_v22 = vmul.f32 %v1658_v16, %v1658_v16  ;;  %v1158_v23 = vpop.f32.mrb[13].mxu0  ;;  %1206 = vmax.xlane.f32.xlu0 %v1205_v17  ;;  %1804 = vrsqrt.f32 %v2331_v14  ;;  %v1214_v33 = vsel %vm414_vm0, %v2331_v14, -inf  ;;  %vm1280_vm3 = vcmp.eq.f32.partialorder %v2331_v14, inf }
 0x2ed   : > { %v1185_v26 = vmul.f32 %v1158_v23, %v1158_v23  ;;  %v1659_v29 = vpop.f32.mrb[14].mxu0  ;;  %1806 = vrsqrt.f32 %v2329_v10  ;;  %v1208_v42 = vsel %vm414_vm0, %v2338_v21, -inf  ;;  %vm1282_vm4 = vcmp.eq.f32.partialorder %v2331_v14, 0.0 }
 0x2ee   : > { %v1195_v30 = vadd.f32 %v1187_v22, %v1179_v20  ;;  %v1188_v31 = vmul.f32 %v1659_v29, %v1659_v29  ;;  %v1161_v32 = vpop.f32.mrb[15].mxu0  ;;  %1808 = vrsqrt.f32 %v2338_v21  ;;  %v1283_v53 = vand.u32 2147483648, %v2331_v14 }
 0x2ef   : > { %v1193_v35 = vadd.f32 %v1185_v26, %v1177_v24  ;;  %v1186_v36 = vmul.f32 %v1161_v32, %v1161_v32  ;;  %1215 = vmax.xlane.f32.xlu1 %v1214_v33  ;;  %vm1259_vm5 = vcmp.eq.f32.partialorder %v2329_v10, inf  ;;  %vm1261_vm6 = vcmp.eq.f32.partialorder %v2329_v10, 0.0 }
 0x2f0   : > { %v2344_v37 = vmul.f32 0.00390625, %v1195_v30  ;;  %v1196_v38 = vadd.f32 %v1188_v31, %v1180_v25  ;;  %v1262_v56 = vand.u32 2147483648, %v2329_v10  ;;  %vm1266_vm7 = vcmp.eq.f32.partialorder %v2338_v21, inf }
 0x2f1   : > { %v2347_v39 = vmul.f32 0.00390625, %v1193_v35  ;;  %v1194_v40 = vadd.f32 %v1186_v36, %v1178_v34  ;;  %vm1268_vm8 = vcmp.eq.f32.partialorder %v2338_v21, 0.0  ;;  %v1269_v63 = vand.u32 2147483648, %v2338_v21 }
 0x2f2   : > { %v2349_v41 = vmul.f32 0.00390625, %v1196_v38  ;;  %v1223_v43 = vsel %vm414_vm0, %v2344_v37, -inf  ;;  %1810 = vrsqrt.f32 %v2344_v37  ;;  %vm1301_vm9 = vcmp.eq.f32.partialorder %v2344_v37, inf }
 0x2f3   : > { %v2356_v44 = vmul.f32 0.00390625, %v1194_v40  ;;  %1209 = vmax.xlane.f32.xlu1 %v1208_v42  ;;  %1224 = vmax.xlane.f32.xlu0 %v1223_v43  ;;  %1812 = vrsqrt.f32 %v2347_v39  ;;  %v1217_v49 = vsel %vm414_vm0, %v2347_v39, -inf  ;;  %vm1287_vm10 = vcmp.eq.f32.partialorder %v2347_v39, inf }
 0x2f4   : > { %v1803_v45 = vpop.eup %1802  ;;  %v1226_v50 = vsel %vm414_vm0, %v2349_v41, -inf  ;;  %vm1289_vm11 = vcmp.eq.f32.partialorder %v2347_v39, 0.0  ;;  %vm1303_vm13 = vcmp.eq.f32.partialorder %v2344_v37, 0.0  ;;  %v1304_v25 = vand.u32 2147483648, %v2344_v37 }
 0x2f5   : > { %v1272_v46 = vmul.f32 %v1803_v45, %v2327_v7  ;;  %1814 = vrsqrt.f32 %v2356_v44  ;;  %v1220_v61 = vsel %vm414_vm0, %v2356_v44, -inf  ;;  %vm1294_vm12 = vcmp.eq.f32.partialorder %v2356_v44, inf }
 0x2f6   : > { %v1805_v48 = vpop.eup %1804  ;;  %1816 = vrsqrt.f32 %v2349_v41  ;;  %vm1296_vm14 = vcmp.eq.f32.partialorder %v2356_v44, 0.0  ;;  %v1297_v31 = vand.u32 2147483648, %v2356_v44  ;;  %vm1308_vm15 = vcmp.eq.f32.partialorder %v2349_v41, inf }
 0x2f7   : > { %1218 = vmax.xlane.f32.xlu0 %v1217_v49  ;;  %1227 = vmax.xlane.f32.xlu1 %v1226_v50  ;;  %v1274_v51 = vsel %vm1273_vm1, %v2327_v7, %v1272_v46  ;;  %v1279_v52 = vmul.f32 %v1805_v48, %v2331_v14  ;;  %v1807_v54 = vpop.eup %1806  ;;  %v1311_v38 = vand.u32 2147483648, %v2349_v41  ;;  %vm1310_vm1 = vcmp.eq.f32.partialorder %v2349_v41, 0.0 }
 0x2f8   : > { %v1277_v55 = vsel %vm1275_vm2, %v1276_v47, %v1274_v51  ;;  %v1258_v59 = vmul.f32 %v1807_v54, %v2329_v10  ;;  %v1809_v60 = vpop.eup %1808  ;;  %v366_v51 = vand.u32 2147483647, %v2255_v5 }
 0x2f9   : > { %v1315_v57 = vmul.f32 %v1277_v55, %v2327_v7  ;;  %v1281_v58 = vsel %vm1280_vm3, %v2331_v14, %v1279_v52  ;;  %v1265_v3 = vmul.f32 %v1809_v60, %v2338_v21  ;;  %v1290_v7 = vand.u32 2147483648, %v2347_v39 }
 0x2fa   : > { %v1284_v62 = vsel %vm1282_vm4, %v1283_v53, %v1281_v58  ;;  %v1260_v2 = vsel %vm1259_vm5, %v2329_v10, %v1258_v59  ;;  %v367_v52 = vand.u32 2147483647, %v2259_v8  ;;  %v1528_v55 = vadd.f32 -0.5, %v366_v51 }
 0x2fb   : > { %1221 = vmax.xlane.f32.xlu1 %v1220_v61  ;;  %v1327_v0 = vsel %vm414_vm0, %v1315_v57, 0.0  ;;  %v1316_v1 = vmul.f32 %v1284_v62, %v2331_v14  ;;  %v1263_v6 = vsel %vm1261_vm6, %v1262_v56, %v1260_v2  ;;  %v1267_v15 = vsel %vm1266_vm7, %v2338_v21, %v1265_v3 }
 0x2fc   : > { %v1811_v4 = vpop.eup %1810  ;;  %1328 = vadd.xlane.f32.xlu0 %v1327_v0  ;;  %v1313_v14 = vmul.f32 %v1263_v6, %v2329_v10  ;;  %v1270_v17 = vsel %vm1268_vm8, %v1269_v63, %v1267_v15  ;;  %v383_v53 = vmul.f32 0.5, %v367_v52  ;;  %v369_v56 = vand.u32 2147483647, %v2266_v13 }
 0x2fd   : > { %v1813_v9 = vpop.eup %1812  ;;  %v1330_v11 = vsel %vm414_vm0, %v1316_v1, 0.0  ;;  %v1300_v16 = vmul.f32 %v1811_v4, %v2344_v37  ;;  %v1314_v10 = vmul.f32 %v1270_v17, %v2338_v21  ;;  %vm374_vm2 = vcmp.lt.f32.partialorder %v366_v51, 1.0 }
 0x2fe   : > { %v1286_v20 = vmul.f32 %v1813_v9, %v2347_v39  ;;  %v1321_v23 = vsel %vm414_vm0, %v1313_v14, 0.0  ;;  %v391_v57 = vmul.f32 %v383_v53, %v367_v52  ;;  %v1529_v58 = vadd.f32 -0.5, %v367_v52 }
 0x2ff   : > { %v1815_v22 = vpop.eup %1814  ;;  %1331 = vadd.xlane.f32.xlu1 %v1330_v11  ;;  %v1302_v24 = vsel %vm1301_vm9, %v2344_v37, %v1300_v16  ;;  %v1324_v34 = vsel %vm414_vm0, %v1314_v10, 0.0  ;;  %vm375_vm3 = vcmp.lt.f32.partialorder %v367_v52, 1.0  ;;  %v370_v59 = vand.u32 2147483647, %v2273_v18 }
 0x300   : > { %v1817_v26 = vpop.eup %1816  ;;  %1322 = vadd.xlane.f32.xlu0 %v1321_v23  ;;  %v1288_v29 = vsel %vm1287_vm10, %v2347_v39, %v1286_v20  ;;  %v1293_v30 = vmul.f32 %v1815_v22, %v2356_v44  ;;  %v1305_v32 = vsel %vm1303_vm13, %v1304_v25, %v1302_v24  ;;  %v371_v60 = vand.u32 2147483647, %v2275_v19 }
 0x301   : > { %v1291_v21 = vsel %vm1289_vm11, %v1290_v7, %v1288_v29  ;;  %v1307_v33 = vmul.f32 %v1817_v26, %v2349_v41  ;;  %v1319_v46 = vmul.f32 %v1305_v32, %v2344_v37  ;;  %v368_v37 = vand.u32 2147483647, %v2264_v12 }
 0x302   : > { %v1317_v35 = vmul.f32 %v1291_v21, %v2347_v39  ;;  %v1295_v36 = vsel %vm1294_vm12, %v2356_v44, %v1293_v30  ;;  %v385_v5 = vmul.f32 0.5, %v369_v56  ;;  %v372_v12 = vand.u32 2147483647, %v2290_v27 }
 0x303   : > { %1325 = vadd.xlane.f32.xlu1 %v1324_v34  ;;  %v1298_v40 = vsel %vm1296_vm14, %v1297_v31, %v1295_v36  ;;  %v1309_v42 = vsel %vm1308_vm15, %v2349_v41, %v1307_v33  ;;  %v1339_v49 = vsel %vm414_vm0, %v1319_v46, 0.0  ;;  %v1530_v8 = vadd.f32 -0.5, %v368_v37 }
 0x304   : > { %v1333_v43 = vsel %vm414_vm0, %v1317_v35, 0.0  ;;  %v1318_v45 = vmul.f32 %v1298_v40, %v2356_v44  ;;  %v1312_v47 = vsel %vm1310_vm1, %v1311_v38, %v1309_v42  ;;  %v382_v44 = vmul.f32 0.5, %v366_v51 }
 0x305   : > { %1334 = vadd.xlane.f32.xlu0 %v1333_v43  ;;  %v1320_v48 = vmul.f32 %v1312_v47, %v2349_v41  ;;  %v384_v41 = vmul.f32 0.5, %v368_v37  ;;  %vm376_vm4 = vcmp.lt.f32.partialorder %v368_v37, 1.0  ;;  %v407_v63 = vsel %vm375_vm3, %v391_v57, %v1529_v58 }
 0x306   : > { %v1336_v39 = vsel %vm414_vm0, %v1318_v45, 0.0  ;;  %v390_v54 = vmul.f32 %v382_v44, %v366_v51  ;;  %v386_v13 = vmul.f32 0.5, %v370_v59  ;;  %v393_v1 = vmul.f32 %v385_v5, %v369_v56 }
 0x307   : > { %1337 = vadd.xlane.f32.xlu1 %v1336_v39  ;;  %v1342_v50 = vsel %vm414_vm0, %v1320_v48, 0.0  ;;  %v392_v61 = vmul.f32 %v384_v41, %v368_v37  ;;  %v1531_v2 = vadd.f32 -0.5, %v369_v56  ;;  %v373_v4 = vand.u32 2147483647, %v2292_v28 }
 0x308   : > { %v406_v62 = vsel %vm374_vm2, %v390_v54, %v1528_v55  ;;  %vm377_vm5 = vcmp.lt.f32.partialorder %v369_v56, 1.0  ;;  %v416_v18 = vsel %vm414_vm0, %v407_v63, 0.0  ;;  %v387_v6 = vmul.f32 0.5, %v371_v60 }
 0x309   : > { %1340 = vadd.xlane.f32.xlu0 %v1339_v49  ;;  %v415_v0 = vsel %vm414_vm0, %v406_v62, 0.0  ;;  %v408_v3 = vsel %vm376_vm4, %v392_v61, %v1530_v8  ;;  %v394_v7 = vmul.f32 %v386_v13, %v370_v59  ;;  %v1532_v9 = vadd.f32 -0.5, %v370_v59 }
 0x30a   : > { %v418_v19 = vsel %vm414_vm0, %v408_v3, 0.0  ;;  %v409_v11 = vsel %vm377_vm5, %v393_v1, %v1531_v2  ;;  %vm378_vm6 = vcmp.lt.f32.partialorder %v370_v59, 1.0  ;;  %v417_v27 = vadd.f32 %v416_v18, %v415_v0 }
 0x30b   : > { %1343 = vadd.xlane.f32.xlu1 %v1342_v50  ;;  %v420_v14 = vsel %vm414_vm0, %v409_v11, 0.0  ;;  %v388_v15 = vmul.f32 0.5, %v372_v12  ;;  %v395_v16 = vmul.f32 %v387_v6, %v371_v60  ;;  %v1533_v17 = vadd.f32 -0.5, %v371_v60 }
 0x30c   : > { %v410_v20 = vsel %vm378_vm6, %v394_v7, %v1532_v9  ;;  %vm379_vm7 = vcmp.lt.f32.partialorder %v371_v60, 1.0  ;;  %v419_v22 = vadd.f32 %v418_v19, %v417_v27  ;;  %v389_v23 = vmul.f32 0.5, %v373_v4 }
 0x30d   : > { %v422_v28 = vsel %vm414_vm0, %v410_v20, 0.0  ;;  %v396_v10 = vmul.f32 %v388_v15, %v372_v12  ;;  %v1534_v24 = vadd.f32 -0.5, %v372_v12  ;;  %v411_v25 = vsel %vm379_vm7, %v395_v16, %v1533_v17 }
 0x30e   : > { %vm380_vm8 = vcmp.lt.f32.partialorder %v372_v12, 1.0  ;;  %vm381_vm9 = vcmp.lt.f32.partialorder %v373_v4, 1.0  ;;  %v1535_v26 = vadd.f32 -0.5, %v373_v4  ;;  %v421_v29 = vadd.f32 %v420_v14, %v419_v22 }
 0x30f   : > { %v397_v30 = vmul.f32 %v389_v23, %v373_v4  ;;  %v412_v31 = vsel %vm380_vm8, %v396_v10, %v1534_v24  ;;  %v424_v21 = vsel %vm414_vm0, %v411_v25, 0.0  ;;  %vm1389_vm12 = vcmask 0  }
 0x310   : > { %v423_v32 = vadd.f32 %v422_v28, %v421_v29  ;;  %v426_v34 = vsel %vm414_vm0, %v412_v31, 0.0 }
 0x311   : > { %v413_v33 = vsel %vm381_vm9, %v397_v30, %v1535_v26 }
 0x312   : > { %v425_v35 = vadd.f32 %v424_v21, %v423_v32  ;;  %v428_v36 = vsel %vm414_vm0, %v413_v33, 0.0 }
 0x314   : > { %v427_v38 = vadd.f32 %v426_v34, %v425_v35 }
 0x316   : > { %v429_v40 = vadd.f32 %v428_v36, %v427_v38 }
 0x318   : > { %430 = vadd.xlane.f32.xlu0 %v429_v40 }
 0x378   : > { %v1213_v42 = vpop.xlane.xlu1 %1212 }
 0x379   : > { %v1207_v43 = vpop.xlane.xlu0 %1206 }
 0x37c   : > { %v1216_v45 = vpop.xlane.xlu1 %1215 }
 0x37d   : > { %v1236_v46 = vmax.f32 %v1213_v42, %v1216_v45 }
 0x37f   : > { %v1237_v47 = vrot.slane %v1236_v46, 4 }
 0x380   : > { %v1210_v39 = vpop.xlane.xlu1 %1209  ;;  %v1225_v48 = vpop.xlane.xlu0 %1224 }
 0x381   : > { %v1238_v49 = vmax.f32 %v1236_v46, %v1237_v47  ;;  %v1229_v50 = vmax.f32 %v1207_v43, %v1210_v39 }
 0x383   : > { %v1239_v51 = vrot.slane %v1238_v49, 2  ;;  %v1230_v52 = vrot.slane %v1229_v50, 4 }
 0x384   : > { %v1219_v44 = vpop.xlane.xlu0 %1218  ;;  %v1228_v37 = vpop.xlane.xlu1 %1227 }
 0x385   : > { %v1231_v53 = vmax.f32 %v1229_v50, %v1230_v52  ;;  %v1250_v54 = vmax.f32 %v1225_v48, %v1228_v37  ;;  %v1240_v55 = vmax.f32 %v1238_v49, %v1239_v51 }
 0x387   : > { %v1232_v56 = vrot.slane %v1231_v53, 2  ;;  %v1251_v41 = vrot.slane %v1250_v54, 4  ;;  %v1241_v61 = vrot.slane %v1240_v55, 1 }
 0x388   : > { %v1222_v57 = vpop.xlane.xlu1 %1221 }
 0x389   : > { %v1233_v58 = vmax.f32 %v1231_v53, %v1232_v56  ;;  %v1252_v59 = vmax.f32 %v1250_v54, %v1251_v41  ;;  %v1243_v60 = vmax.f32 %v1219_v44, %v1222_v57  ;;  %v1329_v5 = vpop.xlane.xlu0 %1328  ;;  %v1242_v4 = vmax.f32 %v1240_v55, %v1241_v61 }
 0x38b   : > { %v1234_v8 = vrot.slane %v1233_v58, 1  ;;  %v1253_v62 = vrot.slane %v1252_v59, 2  ;;  %v1244_v12 = vrot.slane %v1243_v60, 4  ;;  %vm1374_vm10 = vcmp.gt.f32.partialorder %v1242_v4, 0.0 }
 0x38c   : > { %v1332_v63 = vpop.xlane.xlu1 %1331 }
 0x38d   : > { %v1235_v0 = vmax.f32 %v1233_v58, %v1234_v8  ;;  %v1254_v13 = vmax.f32 %v1252_v59, %v1253_v62  ;;  %v1352_v1 = vadd.f32 %v1332_v63, %v1329_v5  ;;  %v1323_v2 = vpop.xlane.xlu0 %1322  ;;  %v1245_v3 = vmax.f32 %v1243_v60, %v1244_v12 }
 0x38f   : > { %v1255_v18 = vrot.slane %v1254_v13, 1  ;;  %v1353_v19 = vrot.slane %v1352_v1, 4  ;;  %v1246_v6 = vrot.slane %v1245_v3, 2  ;;  %1818 = vrsqrt.f32 %v1235_v0 }
 0x390   : > { %v1326_v7 = vpop.xlane.xlu1 %1325  ;;  %1820 = vrsqrt.f32 %v1242_v4  ;;  %vm1373_vm0 = vcmp.gt.f32.partialorder %v1235_v0, 0.0 }
 0x391   : > { %v1354_v9 = vadd.f32 %v1353_v19, %v1352_v1  ;;  %v1345_v11 = vadd.f32 %v1326_v7, %v1323_v2  ;;  %v1247_v27 = vmax.f32 %v1245_v3, %v1246_v6  ;;  %v1256_v15 = vmax.f32 %v1254_v13, %v1255_v18 }
 0x392   : > { %v1335_v14 = vpop.xlane.xlu0 %1334 }
 0x393   : > { %v1355_v16 = vrot.slane %v1354_v9, 2  ;;  %v1346_v17 = vrot.slane %v1345_v11, 4  ;;  %v1248_v20 = vrot.slane %v1247_v27, 1  ;;  %1822 = vrsqrt.f32 %v1256_v15 }
 0x394   : > { %v1338_v22 = vpop.xlane.xlu1 %1337  ;;  %vm1376_vm13 = vcmp.gt.f32.partialorder %v1256_v15, 0.0 }
 0x395   : > { %v1356_v28 = vadd.f32 %v1355_v16, %v1354_v9  ;;  %v1347_v23 = vadd.f32 %v1346_v17, %v1345_v11  ;;  %v1359_v10 = vadd.f32 %v1338_v22, %v1335_v14  ;;  %v1249_v24 = vmax.f32 %v1247_v27, %v1248_v20 }
 0x396   : > { %v1341_v29 = vpop.xlane.xlu0 %1340 }
 0x397   : > { %v1348_v25 = vrot.slane %v1347_v23, 2  ;;  %v1360_v26 = vrot.slane %v1359_v10, 4  ;;  %1824 = vrsqrt.f32 %v1249_v24  ;;  %v1357_v31 = vrot.slane %v1356_v28, 1 }
 0x398   : > { %v1344_v30 = vpop.xlane.xlu1 %1343  ;;  %vm1375_vm11 = vcmp.gt.f32.partialorder %v1249_v24, 0.0 }
 0x399   : > { %v1349_v21 = vadd.f32 %v1348_v25, %v1347_v23  ;;  %v1361_v32 = vadd.f32 %v1360_v26, %v1359_v10  ;;  %v1366_v33 = vadd.f32 %v1344_v30, %v1341_v29  ;;  %v1819_v34 = vpop.eup %1818  ;;  %v1358_v42 = vadd.f32 %v1357_v31, %v1356_v28 }
 0x39a   : > { %v1821_v40 = vpop.eup %1820  ;;  %v1381_v47 = vsel %vm1373_vm0, %v1819_v34, 0.0 }
 0x39b   : > { %v1350_v35 = vrot.slane %v1349_v21, 1  ;;  %v1362_v36 = vrot.slane %v1361_v32, 2  ;;  %v1367_v38 = vrot.slane %v1366_v33, 4  ;;  %v1382_v50 = vsel %vm1374_vm10, %v1821_v40, 0.0 }
 0x39c   : > { %v1386_v37 = vmul.f32 %v1382_v50, %v1358_v42 }
 0x39d   : > { %v1351_v43 = vadd.f32 %v1350_v35, %v1349_v21  ;;  %v1363_v45 = vadd.f32 %v1362_v36, %v1361_v32  ;;  %v1368_v46 = vadd.f32 %v1367_v38, %v1366_v33  ;;  %v1823_v51 = vpop.eup %1822 }
 0x39e   : > { %v1391_v58 = vsel %vm1389_vm12, %v1386_v37, 0.0  ;;  %v1384_v59 = vsel %vm1376_vm13, %v1823_v51, 0.0 }
 0x39f   : > { %v1364_v39 = vrot.slane %v1363_v45, 1  ;;  %v1369_v48 = vrot.slane %v1368_v46, 2  ;;  %v1385_v49 = vmul.f32 %v1381_v47, %v1351_v43 }
 0x3a1   : > { %v1365_v52 = vadd.f32 %v1364_v39, %v1363_v45  ;;  %v1370_v44 = vadd.f32 %v1369_v48, %v1368_v46  ;;  %v1825_v53 = vpop.eup %1824  ;;  %v1390_v56 = vsel %vm1389_vm12, %v1385_v49, 0.0 }
 0x3a2   : > { %v1383_v55 = vsel %vm1375_vm11, %v1825_v53, 0.0  ;;  %v1392_v60 = vadd.f32 %v1391_v58, %v1390_v56 }
 0x3a3   : > { %v1371_v54 = vrot.slane %v1370_v44, 1  ;;  %v1387_v41 = vmul.f32 %v1383_v55, %v1365_v52 }
 0x3a5   : > { %v1372_v57 = vadd.f32 %v1371_v54, %v1370_v44  ;;  %v1393_v5 = vsel %vm1389_vm12, %v1387_v41, 0.0  ;;  %v431_v63 = vpop.xlane.xlu0 %430 }
 0x3a6   : > { %v1394_v8 = vadd.f32 %v1393_v5, %v1392_v60  ;;  %v432_v0 = vrot.slane %v431_v63, 4 }
 0x3a7   : > { %v1388_v61 = vmul.f32 %v1384_v59, %v1372_v57 }
 0x3a8   : > { %v433_v13 = vadd.f32 %v432_v0, %v431_v63 }
 0x3a9   : > { %v1395_v62 = vsel %vm1389_vm12, %v1388_v61, 0.0 }
 0x3aa   : > { %v1396_v12 = vadd.f32 %v1395_v62, %v1394_v8  ;;  %v434_v1 = vrot.slane %v433_v13, 2 }
 0x3ac   : > { %1397 = vadd.xlane.f32.xlu1 %v1396_v12  ;;  %v435_v2 = vadd.f32 %v434_v1, %v433_v13 }
 0x3ae   : > { %v436_v3 = vrot.slane %v435_v2, 1 }
 0x3b0   : > { %v437_v4 = vadd.f32 %v436_v3, %v435_v2 }
 0x3b2   : > { %1668 = vpush %v437_v4 }
 0x3e3   : > { %s1669_s19 = spop %1668 }
 0x439   : > { %v1398_v18 = vpop.xlane.xlu1 %1397 }
 0x43a   : > { %v1399_v19 = vrot.slane %v1398_v18, 4 }
 0x43c   : > { %v1400_v6 = vadd.f32 %v1399_v19, %v1398_v18 }
 0x43e   : > { %v1401_v7 = vrot.slane %v1400_v6, 2 }
 0x440   : > { %v1402_v9 = vadd.f32 %v1401_v7, %v1400_v6 }
 0x442   : > { %v1403_v11 = vrot.slane %v1402_v9, 1 }
 0x444   : > { %v1404_v27 = vadd.f32 %v1403_v11, %v1402_v9 }
 0x446   : > { %1670 = vpush %v1404_v27 }
 0x477   : > { %s1671_s8 = spop %1670 }
 0x478   : > { %s1406_s21 = sadd.f32 %s1671_s8, %s1669_s19 }
 0x47a   : > { %v1407_v14 = vstv %s1406_s21 }
 0x47b   : > { %1408 = vst.msk [vmem:[%s340_s24] sm:$0x1] %vm1389_vm12, %v1407_v14 }
 0x47c PF: > { %p20_p12 = scmp.ge.s32.totalorder %s2126_s15, 4   ;;  %s2504_s21 = smov %s1980_s22 }
 0x47d   : > { %s2505_s22 = smov %s1984_s23  ;;  %s2506_s23 = smov %s2137_s20 }
 0x47e   : > { %s2507_s24 = smov %s2126_s15  ;;  %22 = sbr.rel (!%p20_p12) target bundleno = 6 (0x6), region = 105 }
 0x485   :  { %1426 = vsyncpa [#allocation3], 1 }
 0x486   :  { %1428 = vsyncpa [#allocation3 + $0x1], 1 }
 0x487   :  { %1429 = vsyncpa [#allocation5], 1 }
 0x488   :  { %1431 = vsyncpa [#allocation5 + $0x1], 1 }
 0x489   :  { %1432 = vsyncpa [#allocation8], 1 }

</bundles_post_ra>
